<compile_context>
chip_gen: v7x
topology: tpu7x:2x2x1
jax: 0.10.0
libtpu: 0.0.40
codegen_flags: <defaults>
</compile_context>

<pallas_src>
import functools
import math

import jax
import jax.numpy as jnp
from jax.experimental import pallas as pl
from jax.experimental.pallas import tpu as pltpu


def _make_encoder_kernel(B, L0, C, n_layers, stride, kernel, padding):
    """Build the fused multi-layer strided-conv pooling kernel (all static)."""

    def kernel_fn(x_ref, w_ref, b_ref, o_ref):
        # Full-ref loads only (no gather/strided ref indexing anywhere).
        w_all = w_ref[...].astype(jnp.float32)   # (layers, K, C, C)
        b_all = b_ref[...].astype(jnp.float32)   # (layers, 1, C)
        a = x_ref[...].astype(jnp.float32)       # (B, L0, C), NLC

        L = L0
        for layer in range(n_layers):            # static unroll (layers == 2)
            L_pad = L + 2 * padding
            L_full = L_pad - kernel + 1          # unstrided conv output length
            L_out = (L_pad - kernel) // stride + 1

            # Zero padding along the length (sublane) axis.
            zpad = jnp.zeros((B, padding, C), jnp.float32)
            a_pad = jnp.concatenate([zpad, a, zpad], axis=1)  # (B, L_pad, C)

            # Conv as `kernel` shifted contiguous-slice matmuls on the MXU:
            #   full[i] = sum_k a_pad[i + k] @ W_k + bias
            acc = None
            for k in range(kernel):              # static unroll (kernel == 3)
                tap = a_pad[:, k:k + L_full, :]  # (B, L_full, C), static slice
                contrib = jnp.einsum(
                    'blc,cd->bld', tap, w_all[layer, k],
                    preferred_element_type=jnp.float32)
                acc = contrib if acc is None else acc + contrib
            acc = acc + b_all[layer]             # (B, L_full, C)

            if stride == 1 or L_out == L_full:
                a = acc
            else:
                # Apply the stride with a tiny 0/1 selector matmul
                # (sel[l, j] = [j == stride*l]) -- keeps everything on the MXU
                # and avoids strided loads / sublane gathers.
                rows = jax.lax.broadcasted_iota(jnp.int32, (L_out, L_full), 0)
                cols = jax.lax.broadcasted_iota(jnp.int32, (L_out, L_full), 1)
                sel = (cols == rows * stride).astype(jnp.float32)
                a = jnp.einsum('ij,bjc->bic', sel, acc,
                               preferred_element_type=jnp.float32)
            L = L_out

        # Only the final layer's result ever touches HBM.
        o_ref[...] = a.astype(o_ref.dtype)

    return kernel_fn


def _encoder_pallas(x_nlc, w_taps, b_stack, *, stride, kernel, padding):
    """x_nlc: (B, L, C); w_taps: (layers, K, C, C); b_stack: (layers, 1, C)."""
    B, L0, C = x_nlc.shape
    n_layers = w_taps.shape[0]
    L = L0
    for _ in range(n_layers):
        L = (L + 2 * padding - kernel) // stride + 1
    out_len = L

    kern = _make_encoder_kernel(B, L0, C, n_layers, stride, kernel, padding)
    vmem = pl.BlockSpec(memory_space=pltpu.MemorySpace.VMEM)
    return pl.pallas_call(
        kern,
        out_shape=jax.ShapeDtypeStruct((B, out_len, C), x_nlc.dtype),
        in_specs=[vmem, vmem, vmem],
        out_specs=vmem,
    )(x_nlc, w_taps, b_stack)


@functools.partial(jax.jit, static_argnames=("stride", "kernel", "padding"))
def encoder_forward(struc_ncl, w_taps, b_stack, *, stride, kernel, padding):
    """NCL in / NCL out (torch Conv1d layout); NLC used internally, one
    transpose at each boundary only."""
    x_nlc = jnp.transpose(struc_ncl, (0, 2, 1))
    out_nlc = _encoder_pallas(x_nlc, w_taps, b_stack,
                              stride=stride, kernel=kernel, padding=padding)
    return jnp.transpose(out_nlc, (0, 2, 1))


class Encoder:
    """JAX/Pallas port of DiffMol Encoder: `layers` stacked pooling blocks."""

    def __init__(self, key, hidden_dim=32, layers=2, stride=2, kernel=3,
                 padding=1, dtype=jnp.float32):
        self.layers = layers
        self.stride = stride
        self.kernel = kernel
        self.padding = padding
        self.params = []  # raw torch-layout params (kept for reference checks)
        bound = 1.0 / math.sqrt(hidden_dim * kernel)  # torch Conv1d default init
        for _ in range(layers):
            key, kw, kb = jax.random.split(key, 3)
            w = jax.random.uniform(kw, (hidden_dim, hidden_dim, kernel),
                                   minval=-bound, maxval=bound, dtype=dtype)
            b = jax.random.uniform(kb, (hidden_dim,),
                                   minval=-bound, maxval=bound, dtype=dtype)
            self.params.append((w, b))
        # Kernel-side weight layout precomputed ONCE:
        #   w_taps[l, k, c_in, c_out] = weight_l[c_out, c_in, k]
        self.w_taps = jnp.stack(
            [jnp.transpose(w, (2, 1, 0)) for w, _ in self.params], axis=0)
        self.b_stack = jnp.stack(
            [b.reshape(1, hidden_dim) for _, b in self.params], axis=0)

    def __call__(self, struc):
        # struc: node features, (B, hidden_dim, L) NCL (torch Conv1d layout)
        return encoder_forward(struc, self.w_taps, self.b_stack,
                               stride=self.stride, kernel=self.kernel,
                               padding=self.padding)


def _reference_conv1d(x, w, b, stride, kernel, padding):
    """Pure-JAX reference (lax conv) for a correctness sanity check."""
    y = jax.lax.conv_general_dilated(
        x, w, window_strides=(stride,), padding=[(padding, padding)],
        dimension_numbers=("NCH", "OIH", "NCH"))
    return y + b[None, :, None]


if __name__ == "__main__":
    key = jax.random.PRNGKey(0)
    k_in, k_enc = jax.random.split(key)

    B, C, L = 2, 32, 16  # small: batch=2, hidden_dim=32, seq=16
    struc = jax.random.normal(k_in, (B, C, L), dtype=jnp.float32)

    enc = Encoder(k_enc, hidden_dim=C, layers=2, stride=2, kernel=3, padding=1)
    out = enc(struc)
    out = jax.block_until_ready(out)
    assert out.shape == (B, C, L // 4), out.shape  # 16 -> 8 -> 4 after 2 pools

    # sanity check against a pure-JAX conv reference
    ref = struc
    for w, b in enc.params:
        ref = _reference_conv1d(ref, w, b, 2, 3, 1)
    ref = jax.block_until_ready(ref)
    assert jnp.allclose(out, ref, atol=1e-5, rtol=1e-5)

    print("KERNEL_OK")
</pallas_src>

<mosaic_0001>
module attributes {stable_mosaic.version = 11 : i64} {
  func.func @kernel_fn(%arg0: memref<2x16x32xf32, #tpu.memory_space<vmem>>, %arg1: memref<2x3x32x32xf32, #tpu.memory_space<vmem>>, %arg2: memref<2x1x32xf32, #tpu.memory_space<vmem>>, %arg3: memref<2x4x32xf32, #tpu.memory_space<vmem>>) attributes {dimension_semantics = [], scalar_prefetch = 0 : i64, scratch_operands = 0 : i64, tpu.core_type = #tpu.core_type<tc>} {
    %c0 = arith.constant 0 : index
    %c0_0 = arith.constant 0 : index
    %c0_1 = arith.constant 0 : index
    %c0_2 = arith.constant 0 : index
    %0 = vector.load %arg1[%c0, %c0_0, %c0_1, %c0_2] : memref<2x3x32x32xf32, #tpu.memory_space<vmem>>, vector<2x3x32x32xf32>
    %c0_3 = arith.constant 0 : index
    %c0_4 = arith.constant 0 : index
    %c0_5 = arith.constant 0 : index
    %1 = vector.load %arg2[%c0_3, %c0_4, %c0_5] : memref<2x1x32xf32, #tpu.memory_space<vmem>>, vector<2x1x32xf32>
    %c0_6 = arith.constant 0 : index
    %c0_7 = arith.constant 0 : index
    %c0_8 = arith.constant 0 : index
    %2 = vector.load %arg0[%c0_6, %c0_7, %c0_8] : memref<2x16x32xf32, #tpu.memory_space<vmem>>, vector<2x16x32xf32>
    %cst = arith.constant 0.000000e+00 : f32
    %3 = vector.broadcast %cst : f32 to vector<2x1x32xf32>
    %4 = tpu.concatenate %3, %2, %3 in 1 : vector<2x1x32xf32>, vector<2x16x32xf32>, vector<2x1x32xf32> -> vector<2x18x32xf32>
    %5 = vector.extract_strided_slice %4 {offsets = [0, 0, 0], sizes = [2, 16, 32], strides = [1, 1, 1]} : vector<2x18x32xf32> to vector<2x16x32xf32>
    %6 = vector.extract_strided_slice %0 {offsets = [0, 0, 0, 0], sizes = [1, 1, 32, 32], strides = [1, 1, 1, 1]} : vector<2x3x32x32xf32> to vector<1x1x32x32xf32>
    %7 = vector.shape_cast %6 : vector<1x1x32x32xf32> to vector<32x32xf32>
    "tpu.trace_start"() <{level = 10 : i32, message = "blc,cd->bld"}> : () -> ()
    %cst_9 = arith.constant dense<0.000000e+00> : vector<2x16x32xf32>
    %8 = tpu.matmul %5, %7, %cst_9 {dimension_numbers = #tpu.dot_dimension_numbers<[2], [0], [0, 1], [1], [0, 0, 0, 1, 1, 1], [], []>} : vector<2x16x32xf32>, vector<32x32xf32>, vector<2x16x32xf32> -> vector<2x16x32xf32>
    "tpu.trace_stop"() : () -> ()
    %9 = vector.extract_strided_slice %4 {offsets = [0, 1, 0], sizes = [2, 16, 32], strides = [1, 1, 1]} : vector<2x18x32xf32> to vector<2x16x32xf32>
    %10 = vector.extract_strided_slice %0 {offsets = [0, 1, 0, 0], sizes = [1, 1, 32, 32], strides = [1, 1, 1, 1]} : vector<2x3x32x32xf32> to vector<1x1x32x32xf32>
    %11 = vector.shape_cast %10 : vector<1x1x32x32xf32> to vector<32x32xf32>
    "tpu.trace_start"() <{level = 10 : i32, message = "blc,cd->bld"}> : () -> ()
    %cst_10 = arith.constant dense<0.000000e+00> : vector<2x16x32xf32>
    %12 = tpu.matmul %9, %11, %cst_10 {dimension_numbers = #tpu.dot_dimension_numbers<[2], [0], [0, 1], [1], [0, 0, 0, 1, 1, 1], [], []>} : vector<2x16x32xf32>, vector<32x32xf32>, vector<2x16x32xf32> -> vector<2x16x32xf32>
    "tpu.trace_stop"() : () -> ()
    %13 = arith.addf %8, %12 : vector<2x16x32xf32>
    %14 = vector.extract_strided_slice %4 {offsets = [0, 2, 0], sizes = [2, 16, 32], strides = [1, 1, 1]} : vector<2x18x32xf32> to vector<2x16x32xf32>
    %15 = vector.extract_strided_slice %0 {offsets = [0, 2, 0, 0], sizes = [1, 1, 32, 32], strides = [1, 1, 1, 1]} : vector<2x3x32x32xf32> to vector<1x1x32x32xf32>
    %16 = vector.shape_cast %15 : vector<1x1x32x32xf32> to vector<32x32xf32>
    "tpu.trace_start"() <{level = 10 : i32, message = "blc,cd->bld"}> : () -> ()
    %cst_11 = arith.constant dense<0.000000e+00> : vector<2x16x32xf32>
    %17 = tpu.matmul %14, %16, %cst_11 {dimension_numbers = #tpu.dot_dimension_numbers<[2], [0], [0, 1], [1], [0, 0, 0, 1, 1, 1], [], []>} : vector<2x16x32xf32>, vector<32x32xf32>, vector<2x16x32xf32> -> vector<2x16x32xf32>
    "tpu.trace_stop"() : () -> ()
    %18 = arith.addf %13, %17 : vector<2x16x32xf32>
    %19 = vector.extract_strided_slice %1 {offsets = [0, 0, 0], sizes = [1, 1, 32], strides = [1, 1, 1]} : vector<2x1x32xf32> to vector<1x1x32xf32>
    %20 = vector.shape_cast %19 : vector<1x1x32xf32> to vector<1x32xf32>
    %21 = vector.shape_cast %20 : vector<1x32xf32> to vector<1x1x32xf32>
    %22 = vector.broadcast %21 : vector<1x1x32xf32> to vector<2x16x32xf32>
    %23 = arith.addf %18, %22 : vector<2x16x32xf32>
    %24 = tpu.iota {dimensions = array<i32: 0>} : vector<8x16xi32>
    %25 = tpu.iota {dimensions = array<i32: 1>} : vector<8x16xi32>
    %c2_i32 = arith.constant 2 : i32
    %26 = vector.broadcast %c2_i32 : i32 to vector<8x16xi32>
    %27 = arith.muli %24, %26 : vector<8x16xi32>
    %28 = arith.cmpi eq, %25, %27 : vector<8x16xi32>
    %29 = arith.extui %28 : vector<8x16xi1> to vector<8x16xi32>
    %30 = arith.sitofp %29 : vector<8x16xi32> to vector<8x16xf32>
    "tpu.trace_start"() <{level = 10 : i32, message = "ij,bjc->bic"}> : () -> ()
    %cst_12 = arith.constant dense<0.000000e+00> : vector<2x32x8xf32>
    %31 = tpu.matmul %23, %30, %cst_12 {dimension_numbers = #tpu.dot_dimension_numbers<[1], [1], [0, 2], [0], [0, 0, 0, 2, 1, 0], [], []>} : vector<2x16x32xf32>, vector<8x16xf32>, vector<2x32x8xf32> -> vector<2x32x8xf32>
    %32 = tpu.transpose %31, [0, 2, 1] : vector<2x32x8xf32> -> vector<2x8x32xf32>
    %cst_13 = arith.constant 0.000000e+00 : f32
    "tpu.trace_stop"() : () -> ()
    %33 = vector.broadcast %cst_13 : f32 to vector<2x1x32xf32>
    %34 = tpu.concatenate %33, %32, %33 in 1 : vector<2x1x32xf32>, vector<2x8x32xf32>, vector<2x1x32xf32> -> vector<2x10x32xf32>
    %35 = vector.extract_strided_slice %34 {offsets = [0, 0, 0], sizes = [2, 8, 32], strides = [1, 1, 1]} : vector<2x10x32xf32> to vector<2x8x32xf32>
    %36 = vector.extract_strided_slice %0 {offsets = [1, 0, 0, 0], sizes = [1, 1, 32, 32], strides = [1, 1, 1, 1]} : vector<2x3x32x32xf32> to vector<1x1x32x32xf32>
    %37 = vector.shape_cast %36 : vector<1x1x32x32xf32> to vector<32x32xf32>
    "tpu.trace_start"() <{level = 10 : i32, message = "blc,cd->bld"}> : () -> ()
    %cst_14 = arith.constant dense<0.000000e+00> : vector<2x8x32xf32>
    %38 = tpu.matmul %35, %37, %cst_14 {dimension_numbers = #tpu.dot_dimension_numbers<[2], [0], [0, 1], [1], [0, 0, 0, 1, 1, 1], [], []>} : vector<2x8x32xf32>, vector<32x32xf32>, vector<2x8x32xf32> -> vector<2x8x32xf32>
    "tpu.trace_stop"() : () -> ()
    %39 = vector.extract_strided_slice %34 {offsets = [0, 1, 0], sizes = [2, 8, 32], strides = [1, 1, 1]} : vector<2x10x32xf32> to vector<2x8x32xf32>
    %40 = vector.extract_strided_slice %0 {offsets = [1, 1, 0, 0], sizes = [1, 1, 32, 32], strides = [1, 1, 1, 1]} : vector<2x3x32x32xf32> to vector<1x1x32x32xf32>
    %41 = vector.shape_cast %40 : vector<1x1x32x32xf32> to vector<32x32xf32>
    "tpu.trace_start"() <{level = 10 : i32, message = "blc,cd->bld"}> : () -> ()
    %cst_15 = arith.constant dense<0.000000e+00> : vector<2x8x32xf32>
    %42 = tpu.matmul %39, %41, %cst_15 {dimension_numbers = #tpu.dot_dimension_numbers<[2], [0], [0, 1], [1], [0, 0, 0, 1, 1, 1], [], []>} : vector<2x8x32xf32>, vector<32x32xf32>, vector<2x8x32xf32> -> vector<2x8x32xf32>
    "tpu.trace_stop"() : () -> ()
    %43 = arith.addf %38, %42 : vector<2x8x32xf32>
    %44 = vector.extract_strided_slice %34 {offsets = [0, 2, 0], sizes = [2, 8, 32], strides = [1, 1, 1]} : vector<2x10x32xf32> to vector<2x8x32xf32>
    %45 = vector.extract_strided_slice %0 {offsets = [1, 2, 0, 0], sizes = [1, 1, 32, 32], strides = [1, 1, 1, 1]} : vector<2x3x32x32xf32> to vector<1x1x32x32xf32>
    %46 = vector.shape_cast %45 : vector<1x1x32x32xf32> to vector<32x32xf32>
    "tpu.trace_start"() <{level = 10 : i32, message = "blc,cd->bld"}> : () -> ()
    %cst_16 = arith.constant dense<0.000000e+00> : vector<2x8x32xf32>
    %47 = tpu.matmul %44, %46, %cst_16 {dimension_numbers = #tpu.dot_dimension_numbers<[2], [0], [0, 1], [1], [0, 0, 0, 1, 1, 1], [], []>} : vector<2x8x32xf32>, vector<32x32xf32>, vector<2x8x32xf32> -> vector<2x8x32xf32>
    "tpu.trace_stop"() : () -> ()
    %48 = arith.addf %43, %47 : vector<2x8x32xf32>
    %49 = vector.extract_strided_slice %1 {offsets = [1, 0, 0], sizes = [1, 1, 32], strides = [1, 1, 1]} : vector<2x1x32xf32> to vector<1x1x32xf32>
    %50 = vector.shape_cast %49 : vector<1x1x32xf32> to vector<1x32xf32>
    %51 = vector.shape_cast %50 : vector<1x32xf32> to vector<1x1x32xf32>
    %52 = vector.broadcast %51 : vector<1x1x32xf32> to vector<2x8x32xf32>
    %53 = arith.addf %48, %52 : vector<2x8x32xf32>
    %54 = tpu.iota {dimensions = array<i32: 0>} : vector<4x8xi32>
    %55 = tpu.iota {dimensions = array<i32: 1>} : vector<4x8xi32>
    %c2_i32_17 = arith.constant 2 : i32
    %56 = vector.broadcast %c2_i32_17 : i32 to vector<4x8xi32>
    %57 = arith.muli %54, %56 : vector<4x8xi32>
    %58 = arith.cmpi eq, %55, %57 : vector<4x8xi32>
    %59 = arith.extui %58 : vector<4x8xi1> to vector<4x8xi32>
    %60 = arith.sitofp %59 : vector<4x8xi32> to vector<4x8xf32>
    "tpu.trace_start"() <{level = 10 : i32, message = "ij,bjc->bic"}> : () -> ()
    %cst_18 = arith.constant dense<0.000000e+00> : vector<2x32x4xf32>
    %61 = tpu.matmul %53, %60, %cst_18 {dimension_numbers = #tpu.dot_dimension_numbers<[1], [1], [0, 2], [0], [0, 0, 0, 2, 1, 0], [], []>} : vector<2x8x32xf32>, vector<4x8xf32>, vector<2x32x4xf32> -> vector<2x32x4xf32>
    %62 = tpu.transpose %61, [0, 2, 1] : vector<2x32x4xf32> -> vector<2x4x32xf32>
    "tpu.trace_stop"() : () -> ()
    %c0_19 = arith.constant 0 : index
    %c0_20 = arith.constant 0 : index
    %c0_21 = arith.constant 0 : index
    %63 = vector.load %arg3[%c0_19, %c0_20, %c0_21] : memref<2x4x32xf32, #tpu.memory_space<vmem>>, vector<2x4x32xf32>
    tpu.vector_store %arg3[%c0_19, %c0_20, %c0_21], %62 {strides = array<i32>} : memref<2x4x32xf32, #tpu.memory_space<vmem>>, vector<2x4x32xf32>,
    return
  }
}

</mosaic_0001>

<bundles_post_ra>
// kernel: encoder_forward.1
= control target key start
LH: loop header
LB: loop body
LE: loop exit
PB: predicated region body
PF: predicated region fallthrough
CT: control target
= control target key end

     0   :  { %8 = vsyncpa [#allocation3], 0  ;;  %s1719_s0 = inlined_call_operand.hbm [shape: f32[2,16,32], index: 0, kind: input, shape index: {}]   ;;  %s1720_s1 = inlined_call_operand.hbm [shape: f32[2,3,32,32], index: 1, kind: input, shape index: {}]   ;;  %s1721_s2 = inlined_call_operand.vmem [shape: f32[2,1,32], index: 2, kind: input, shape index: {}]   ;;  %s1722_s3 = inlined_call_operand.hbm [shape: f32[2,4,32], index: 3, kind: output, shape index: {}]  }
   0x1   :  { %9 = vsyncpa [#allocation6], 0 }
   0x2   :  { %10 = vsyncpa [#allocation4], 0  ;;  %s1579_s12 = smov [#allocation2]   ;;  %s1507_s16 = scalar_lea.hbm %s1719_s0, 512 }
   0x3   :  { %s16_s13 = sshll.u32 %s1579_s12, 4  ;;  %p1508_p0 = scmp.ne.s32.totalorder %s1719_s0, %s1507_s16  ;;  %s17_s13 = int_to_ptr.vmem [resolvable:$true] %s16_s13 }
   0x4   :  { %p1511_p1 = scmp.lt.u32.totalorder %s1507_s16, %s1719_s0 }
   0x6   :  { %p1513_p2 = pnand %p1511_p1, %p1508_p0 }
   0x8   :  { %1516 = shalt.err (!%p1513_p2)
}
   0x9   :  { %s1517_s21 = scalar_lea.vmem %s17_s13, 512  ;;  %p1522_p4 = scmp.lt.s32.totalorder %s17_s13, %s17_s13 }
   0xa   :  { %p1518_p3 = scmp.ne.s32.totalorder %s17_s13, %s1517_s21  ;;  %p1523_p5 = scmp.lt.s32.totalorder %s1517_s21, %s1517_s21 }
   0xc   :  { %p1524_p6 = por %p1523_p5, %p1522_p4 }
   0xe   :  { %p1525_p7 = pnand %p1524_p6, %p1518_p3 }
  0x10   :  { %1528 = shalt.err (!%p1525_p7)
}
  0x11   :  { %s1580_s22 = smov 128   ;;  %s1581_s23 = smov 8  }
  0x12   :  { %22 = dma.hbm_to_vmem [thread:$0]  %s1719_s0, 512, %s17_s13, [#allocation3], %s1580_s22, %s1580_s22, %s1581_s23  }
  0x13   :  { %s1582_s26 = smov [#allocation5]   ;;  %s1529_s30 = scalar_lea.hbm %s1720_s1, 3072 }
  0x14   :  { %s28_s27 = sshll.u32 %s1582_s26, 4  ;;  %p1530_p8 = scmp.ne.s32.totalorder %s1720_s1, %s1529_s30  ;;  %s29_s27 = int_to_ptr.vmem [resolvable:$true] %s28_s27 }
  0x15   :  { %p1533_p9 = scmp.lt.u32.totalorder %s1529_s30, %s1720_s1 }
  0x17   :  { %p1535_p10 = pnand %p1533_p9, %p1530_p8 }
  0x19   :  { %1538 = shalt.err (!%p1535_p10)
}
  0x1a   :  { %s1539_s8 = scalar_lea.vmem %s29_s27, 3072  ;;  %p1544_p12 = scmp.lt.s32.totalorder %s29_s27, %s29_s27 }
  0x1b   :  { %p1540_p11 = scmp.ne.s32.totalorder %s29_s27, %s1539_s8  ;;  %p1545_p13 = scmp.lt.s32.totalorder %s1539_s8, %s1539_s8 }
  0x1d   :  { %p1546_p0 = por %p1545_p13, %p1544_p12 }
  0x1f   :  { %p1547_p1 = pnand %p1546_p0, %p1540_p11 }
  0x21   :  { %1550 = shalt.err (!%p1547_p1)
}
  0x22   :  { %34 = dma.hbm_to_vmem [thread:$0]  %s1720_s1, 3072, %s29_s27, [#allocation6], %s1580_s22, %s1580_s22, %s1581_s23  }
  0x23   :  { %1573 = dma.done.wait [#allocation3], 512  }
  0x24   :  { %1574 = vsyncadd [#allocation3], 4294966784 }
  0x25   :  { %1575 = dma.done.wait [#allocation6], 3072  }
  0x26   :  { %1576 = vsyncadd [#allocation6], 4294964224  ;;  %v47_v0 = vld [vmem:[#allocation5 + $0x20] sm:$0xff]  ;;  %v48_v1 = vld [vmem:[#allocation5 + $0x28] sm:$0xff]  ;;  %vm77_vm0 = vcmask 1040384   ;;  %vm96_vm1 = vcmask 1046528   ;;  %v412_v52 = vlaneseq }
  0x27   :  { %v49_v2 = vld [vmem:[#allocation5 + $0x30] sm:$0xff]  ;;  %v1437_v3 = vpack.c.bf16 %v48_v1, %v47_v0  ;;  %v50_v4 = vld [vmem:[#allocation5 + $0x38] sm:$0xff]  ;;  %v69_v5 = vld [vmem:[#allocation2] sm:$0xff]  ;;  %vm107_vm2 = vcmask 261120   ;;  %vm294_vm3 = vcmask 1045504   ;;  %v1583_v61 = vmov 0.0  }
  0x28   :  { %v70_v6 = vld [vmem:[#allocation2 + $0x8] sm:$0xff]  ;;  %v1441_v7 = vpack.c.bf16 %v50_v4, %v49_v2  ;;  %v78_v8 = vrot.slane %v69_v5, 7  ;;  %v43_v10 = vld [vmem:[#allocation5] sm:$0xff]  ;;  %v71_v12 = vld [vmem:[#allocation2 + $0x10] sm:$0xff]  ;;  %v413_v54 = vshrl.u32 %v412_v52, 7  ;;  %v415_v57 = vand.u32 127, %v412_v52 }
  0x29   :  { %v79_v9 = vrot.slane %v70_v6, 7  ;;  %v44_v11 = vld [vmem:[#allocation5 + $0x8] sm:$0xff]  ;;  %1438 = vmatprep.subr.bf16.mxu0 %v1437_v3  ;;  %v72_v13 = vld [vmem:[#allocation2 + $0x18] sm:$0xff]  ;;  %v81_v14 = vrot.slane %v71_v12, 7  ;;  %v45_v26 = vld [vmem:[#allocation5 + $0x10] sm:$0xff]  ;;  %vm484_vm5 = vcmask 130048  }
  0x2a   :  { %1440 = vmatpush3.bf16.msra.mxu0 %v1437_v3  ;;  %v88_v16 = vsel %vm77_vm0, 0.0, %v78_v8  ;;  %v82_v18 = vrot.slane %v72_v13, 7  ;;  %v1445_v22 = vpack.c.bf16 %v44_v11, %v43_v10  ;;  %v46_v27 = vld [vmem:[#allocation5 + $0x18] sm:$0xff]  ;;  %v51_v35 = vld [vmem:[#allocation5 + $0x40] sm:$0xff]  ;;  %v52_v36 = vld [vmem:[#allocation5 + $0x48] sm:$0xff]  ;;  %v416_v58 = vmul.u32 2, %v413_v54 }
  0x2b   :  { %v80_v15 = vsel %vm77_vm0, %v78_v8, %v79_v9  ;;  %v90_v17 = vsel %vm77_vm0, %v79_v9, 0.0  ;;  %1442 = vmatprep.subr.bf16.mxu0 %v1441_v7  ;;  %v97_v19 = vrot.slane %v88_v16, 1  ;;  %v89_v24 = vsel %vm77_vm0, 0.0, %v81_v14  ;;  %v53_v39 = vld [vmem:[#allocation5 + $0x50] sm:$0xff]  ;;  %v54_v40 = vld [vmem:[#allocation5 + $0x58] sm:$0xff]  ;;  %v59_v11 = vld [vmem:[#allocation5 + $0x80] sm:$0xff] }
  0x2c   :  { %v98_v20 = vrot.slane %v80_v15, 1  ;;  %v100_v21 = vrot.slane %v90_v17, 1  ;;  %v83_v23 = vsel %vm77_vm0, %v81_v14, %v82_v18  ;;  %v91_v25 = vsel %vm77_vm0, %v82_v18, 0.0  ;;  %v1247_v53 = vld [vmem:[%s1721_s2] ss:$0 sm:$0xff]  ;;  %v60_v12 = vld [vmem:[#allocation5 + $0x88] sm:$0xff] }
  0x2d   :  { %v102_v29 = vrot.slane %v89_v24, 1  ;;  %v103_v30 = vrot.slane %v83_v23, 1  ;;  %v105_v32 = vrot.slane %v91_v25, 1  ;;  %v1449_v34 = vpack.c.bf16 %v46_v27, %v45_v26  ;;  %v61_v13 = vld [vmem:[#allocation5 + $0x90] sm:$0xff]  ;;  %v56_v26 = vld [vmem:[#allocation5 + $0x68] sm:$0xff] }
  0x2e   :  { %v99_v28 = vsel %vm96_vm1, %v97_v19, %v98_v20  ;;  %1444 = vmatpush3.bf16.msra.mxu0 %v1441_v7  ;;  %v101_v31 = vsel %vm96_vm1, %v98_v20, %v100_v21  ;;  %v1453_v38 = vpack.c.bf16 %v52_v36, %v51_v35  ;;  %v1457_v41 = vpack.c.bf16 %v54_v40, %v53_v39 }
  0x2f   :  { %1342 = vmatprep.mubr.msk.f32.mxu0 %vm107_vm2, %v99_v28  ;;  %1446 = vmatprep.subr.bf16.mxu0 %v1445_v22  ;;  %v104_v33 = vsel %vm96_vm1, %v102_v29, %v103_v30  ;;  %v106_v37 = vsel %vm96_vm1, %v103_v30, %v105_v32  ;;  %v295_v42 = vrot.slane %v88_v16, 2  ;;  %v296_v43 = vrot.slane %v80_v15, 2 }
  0x30   :  { %v298_v44 = vrot.slane %v90_v17, 2  ;;  %v300_v46 = vrot.slane %v89_v24, 2  ;;  %v301_v47 = vrot.slane %v83_v23, 2  ;;  %v303_v49 = vrot.slane %v91_v25, 2  ;;  %v55_v25 = vld [vmem:[#allocation5 + $0x60] sm:$0xff] }
  0x31   :  { %1343 = vmatmul.mubr.msk.f32.vlgmr.msra.gmra.mrb[0].mxu0 %vm107_vm2, %v101_v31  ;;  %v297_v45 = vsel %vm294_vm3, %v295_v42, %v296_v43  ;;  %vm417_vm4 = vcmp.eq.s32.totalorder %v415_v57, %v416_v58  ;;  %v1461_v14 = vpack.c.bf16 %v60_v12, %v59_v11  ;;  %v1469_v27 = vpack.c.bf16 %v56_v26, %v55_v25  ;;  %v1264_v57 = vld [vmem:[%s1721_s2 + $0x1] ss:$0 sm:$0xff]  ;;  %s1584_s2 = smov [#allocation7]  }
  0x32   :  { %1448 = vmatpush3.bf16.msra.mxu0 %v1445_v22  ;;  %1345 = vmatprep.mubr.msk.f32.mxu0 %vm107_vm2, %v104_v33  ;;  %v299_v48 = vsel %vm294_vm3, %v296_v43, %v298_v44  ;;  %v302_v50 = vsel %vm294_vm3, %v300_v46, %v301_v47  ;;  %v304_v51 = vsel %vm294_vm3, %v301_v47, %v303_v49  ;;  %v1660_v62 = vsel %vm417_vm4, 1.0, %v1583_v61  ;;  %v64_v46 = vld [vmem:[#allocation5 + $0xa8] sm:$0xff]  ;;  %v66_v49 = vld [vmem:[#allocation5 + $0xb8] sm:$0xff]  ;;  %s1222_s13 = sshll.u32 %s1584_s2, 4  ;;  %s1223_s13 = int_to_ptr.vmem [resolvable:$true] %s1222_s13 }
  0x33   :  { %1450 = vmatprep.subr.bf16.mxu0 %v1449_v34  ;;  %1376 = vmatprep.subr.msk.mxu1 %vm484_vm5, %v1660_v62  ;;  %vm1018_vm6 = vcmask 64512   ;;  %vm1214_vm7 = vcmask 257024   ;;  %s1551_s14 = scalar_lea.vmem %s1223_s13, 128  ;;  %p1556_p3 = scmp.lt.s32.totalorder %s1223_s13, %s1223_s13 }
  0x34   :  { %1377 = vmatpush3.xpose.msk.msra.mxu1 %vm484_vm5, %v1660_v62  ;;  %p1552_p2 = scmp.ne.s32.totalorder %s1223_s13, %s1551_s14  ;;  %p1557_p4 = scmp.lt.s32.totalorder %s1551_s14, %s1551_s14 }
  0x35   :  { %1346 = vmatmul.mubr.msk.f32.gmra.mrb[2].mxu0 %vm107_vm2, %v106_v37  ;;  %1462 = vmatprep.subr.bf16.mxu1 %v1461_v14  ;;  %v57_v37 = vld [vmem:[#allocation5 + $0x70] sm:$0xff] }
  0x36   :  { %1452 = vmatpush3.bf16.msra.mxu0 %v1449_v34  ;;  %1356 = vmatprep.mubr.msk.f32.mxu0 %vm107_vm2, %v88_v16  ;;  %p1558_p5 = por %p1557_p4, %p1556_p3 }
  0x37   :  { %1454 = vmatprep.subr.bf16.mxu0 %v1453_v38 }
  0x38   :  { %p1559_p6 = pnand %p1558_p5, %p1552_p2 }
  0x39   :  { %1357 = vmatmul.mubr.msk.f32.vlgmr.msra.gmra.mrb[0].mxu0 %vm107_vm2, %v80_v15  ;;  %v62_v15 = vld [vmem:[#allocation5 + $0x98] sm:$0xff] }
  0x3a   :  { %1456 = vmatpush3.bf16.msra.mxu0 %v1453_v38  ;;  %1359 = vmatprep.mubr.msk.f32.mxu0 %vm107_vm2, %v89_v24  ;;  %v1465_v16 = vpack.c.bf16 %v62_v15, %v61_v13  ;;  %v58_v38 = vld [vmem:[#allocation5 + $0x78] sm:$0xff] }
  0x3b   :  { %1458 = vmatprep.subr.bf16.mxu0 %v1457_v41  ;;  %v1473_v43 = vpack.c.bf16 %v58_v38, %v57_v37 }
  0x3d   :  { %1360 = vmatmul.mubr.msk.f32.gmra.mrb[2].mxu0 %vm107_vm2, %v83_v23 }
  0x3e   :  { %1460 = vmatpush3.bf16.msra.mxu0 %v1457_v41  ;;  %1370 = vmatprep.mubr.msk.f32.mxu0 %vm107_vm2, %v297_v45  ;;  %v63_v45 = vld [vmem:[#allocation5 + $0xa0] sm:$0xff] }
  0x3f   :  { %v1477_v47 = vpack.c.bf16 %v64_v46, %v63_v45  ;;  %1423 = vmatprep.subr.msk.mxu0 %vm1018_vm6, %v1660_v62 }
  0x41   :  { %1371 = vmatmul.mubr.msk.f32.vlgmr.msra.gmra.mrb[0].mxu0 %vm107_vm2, %v299_v48  ;;  %v65_v48 = vld [vmem:[#allocation5 + $0xb0] sm:$0xff] }
  0x42   :  { %1373 = vmatprep.mubr.msk.f32.mxu0 %vm107_vm2, %v302_v50  ;;  %v1481_v52 = vpack.c.bf16 %v66_v49, %v65_v48 }
  0x45   :  { %1374 = vmatmul.mubr.msk.f32.gmra.mrb[2].mxu0 %vm107_vm2, %v304_v51 }
  0x47   :  { %1424 = vmatpush3.xpose.msk.msra.mxu0 %vm1018_vm6, %v1660_v62 }
 0x114   :  { %v1372_v55 = vpop.f32.mrb[0].mxu0 }
 0x115   :  { %v379_v56 = vpop.f32.mrb[1].mxu0  ;;  %v409_v0 = vadd.f32 %v1372_v55, %v1247_v53 }
 0x116   :  { %v408_v59 = vadd.f32 %v1247_v53, %v379_v56 }
 0x118   :  { %420 = vxpose.xlu0.b32.start [1/2] (short) (narrow) %v408_v59, 32  ;;  %v1375_v60 = vpop.f32.mrb[2].mxu0 }
 0x119   :  { %v389_v63 = vpop.f32.mrb[3].mxu0  ;;  %v411_v2 = vadd.f32 %v1375_v60, %v1247_v53 }
 0x11a   :  { %v410_v1 = vadd.f32 %v1247_v53, %v389_v63 }
 0x11c   :  { %421 = vxpose.xlu0.b32.end [2/2] (short) (narrow) %v409_v0, 32  ;;  %452 = vxpose.xlu1.b32.start [1/2] (short) (narrow) %v410_v1, 32 }
 0x120   :  { %453 = vxpose.xlu1.b32.end [2/2] (short) (narrow) %v411_v2, 32 }
 0x198   :  { %v436_v3 = vpop.trf.xlu0 }
 0x199   :  { %1378 = vmatprep.mubr.msk.f32.mxu1 %vm484_vm5, %v436_v3 }
 0x19c   :  { %v437_v4 = vpop.trf.xlu0  ;;  %v468_v5 = vpop.trf.xlu1 }
 0x19d   :  { %1379 = vmatmul.mubr.msk.f32.vlgmr.msra.gmra.mrb[0].mxu1 %vm484_vm5, %v437_v4 }
 0x19e   :  { %1464 = vmatpush3.bf16.msra.mxu1 %v1461_v14 }
 0x19f   :  { %1466 = vmatprep.subr.bf16.mxu1 %v1465_v16 }
 0x1a0   :  { %v438_v6 = vpop.trf.xlu0  ;;  %v469_v7 = vpop.trf.xlu1 }
 0x1a1   :  { %1381 = vmatprep.mubr.msk.f32.mxu1 %vm484_vm5, %v438_v6 }
 0x1a2   :  { %1468 = vmatpush3.bf16.msra.mxu1 %v1465_v16 }
 0x1a3   :  { %1470 = vmatprep.subr.bf16.mxu1 %v1469_v27 }
 0x1a4   :  { %v439_v8 = vpop.trf.xlu0  ;;  %v470_v9 = vpop.trf.xlu1 }
 0x1a5   :  { %1382 = vmatmul.mubr.msk.f32.gmra.mrb[2].mxu1 %vm484_vm5, %v439_v8 }
 0x1a6   :  { %1384 = vmatprep.mubr.msk.f32.mxu1 %vm484_vm5, %v468_v5 }
 0x1a8   :  { %v471_v10 = vpop.trf.xlu1 }
 0x1a9   :  { %1385 = vmatmul.mubr.msk.f32.gmra.mrb[4].mxu1 %vm484_vm5, %v469_v7 }
 0x1aa   :  { %1387 = vmatprep.mubr.msk.f32.mxu1 %vm484_vm5, %v470_v9 }
 0x1ad   :  { %1388 = vmatmul.mubr.msk.f32.gmra.mrb[6].mxu1 %vm484_vm5, %v471_v10 }
 0x270   :  { %v1380_v17 = vpop.f32.mrb[0].mxu1 }
 0x271   :  { %v578_v18 = vpop.f32.mrb[1].mxu1 }
 0x272   :  { %617 = vxpose.xlu0.b32.start [1/4] (short) (narrow) %v578_v18, 8 }
 0x276   :  { %618 = vxpose.xlu0.b32.cont [2/4] (short) (narrow) %v1380_v17, 8 }
 0x278   :  { %v1383_v19 = vpop.f32.mrb[2].mxu1 }
 0x279   :  { %v588_v20 = vpop.f32.mrb[3].mxu1 }
 0x27a   :  { %619 = vxpose.xlu0.b32.cont [3/4] (short) (narrow) %v588_v20, 8 }
 0x27c   :  { %v1386_v21 = vpop.f32.mrb[4].mxu1 }
 0x27d   :  { %v598_v22 = vpop.f32.mrb[5].mxu1 }
 0x27e   :  { %620 = vxpose.xlu0.b32.end [4/4] (short) (narrow) %v1383_v19, 8  ;;  %649 = vxpose.xlu1.b32.start [1/4] (short) (narrow) %v598_v22, 8 }
 0x280   :  { %v1389_v23 = vpop.f32.mrb[6].mxu1 }
 0x281   :  { %v608_v24 = vpop.f32.mrb[7].mxu1 }
 0x282   :  { %650 = vxpose.xlu1.b32.cont [2/4] (short) (narrow) %v1386_v21, 8 }
 0x286   :  { %651 = vxpose.xlu1.b32.cont [3/4] (short) (narrow) %v608_v24, 8 }
 0x28a   :  { %652 = vxpose.xlu1.b32.end [4/4] (short) (narrow) %v1389_v23, 8 }
 0x2f2   :  { %v633_v28 = vpop.trf.xlu0 }
 0x2f3   :  { %v683_v29 = vrot.slane %v633_v28, 7 }
 0x2f5   :  { %v687_v30 = vsel %vm77_vm0, 0.0, %v683_v29  ;;  %v689_v31 = vsel %vm77_vm0, %v683_v29, 0.0 }
 0x2f6   :  { %v695_v32 = vrot.slane %v687_v30, 1  ;;  %v696_v33 = vrot.slane %v689_v31, 1  ;;  %v859_v50 = vrot.slane %v687_v30, 2  ;;  %v860_v51 = vrot.slane %v689_v31, 2 }
 0x2f8   :  { %v697_v34 = vsel %vm96_vm1, %v695_v32, %v696_v33  ;;  %v861_v53 = vsel %vm294_vm3, %v859_v50, %v860_v51 }
 0x2f9   :  { %1398 = vmatprep.mubr.msk.f32.mxu1 %vm107_vm2, %v697_v34 }
 0x2fe   :  { %v665_v35 = vpop.trf.xlu1 }
 0x2ff   :  { %v684_v36 = vrot.slane %v665_v35, 7 }
 0x301   :  { %v688_v39 = vsel %vm77_vm0, 0.0, %v684_v36  ;;  %v690_v40 = vsel %vm77_vm0, %v684_v36, 0.0 }
 0x302   :  { %v698_v41 = vrot.slane %v688_v39, 1  ;;  %v699_v42 = vrot.slane %v690_v40, 1  ;;  %v862_v54 = vrot.slane %v688_v39, 2  ;;  %v863_v55 = vrot.slane %v690_v40, 2 }
 0x304   :  { %v700_v44 = vsel %vm96_vm1, %v698_v41, %v699_v42  ;;  %v864_v56 = vsel %vm294_vm3, %v862_v54, %v863_v55 }
 0x305   :  { %1399 = vmatmul.mubr.msk.f32.vlgmr.msra.gmra.mrb[8].mxu1 %vm107_vm2, %v700_v44 }
 0x306   :  { %1472 = vmatpush3.bf16.msra.mxu1 %v1469_v27  ;;  %1409 = vmatprep.mubr.msk.f32.mxu1 %vm107_vm2, %v687_v30 }
 0x307   :  { %1474 = vmatprep.subr.bf16.mxu1 %v1473_v43 }
 0x30a   :  { %1476 = vmatpush3.bf16.msra.mxu1 %v1473_v43 }
 0x30b   :  { %1478 = vmatprep.subr.bf16.mxu1 %v1477_v47 }
 0x30d   :  { %1410 = vmatmul.mubr.msk.f32.vlgmr.msra.gmra.mrb[8].mxu1 %vm107_vm2, %v688_v39 }
 0x30e   :  { %1480 = vmatpush3.bf16.msra.mxu1 %v1477_v47  ;;  %1420 = vmatprep.mubr.msk.f32.mxu1 %vm107_vm2, %v861_v53 }
 0x30f   :  { %1482 = vmatprep.subr.bf16.mxu1 %v1481_v52 }
 0x312   :  { %1484 = vmatpush3.bf16.msra.mxu1 %v1481_v52 }
 0x313   :  { %1485 = vmatprep.subr.msk.mxu1 %vm1018_vm6, %v1660_v62 }
 0x315   :  { %1421 = vmatmul.mubr.msk.f32.vlgmr.msra.gmra.mrb[8].mxu1 %vm107_vm2, %v864_v56 }
 0x31b   :  { %1486 = vmatpush3.xpose.msk.msra.mxu1 %vm1018_vm6, %v1660_v62 }
 0x3e8   :  { %v1422_v58 = vpop.f32.mrb[8].mxu1 }
 0x3e9   :  { %v953_v59 = vadd.f32 %v1422_v58, %v1264_v57  ;;  %v935_v60 = vpop.f32.mrb[9].mxu1 }
 0x3ea   :  { %v952_v61 = vadd.f32 %v1264_v57, %v935_v60 }
 0x3eb   :  { %986 = vxpose.xlu1.b32.start.end [1/1] (short) (narrow) %v953_v59, 32 }
 0x3ec   :  { %954 = vxpose.xlu0.b32.start.end [1/1] (short) (narrow) %v952_v61, 32 }
 0x46b   :  { %v1002_v63 = vpop.trf.xlu1 }
 0x46c   :  { %v970_v0 = vpop.trf.xlu0 }
 0x46d   :  { %1425 = vmatprep.mubr.msk.f32.mxu0 %vm1018_vm6, %v970_v0 }
 0x46f   :  { %v1003_v1 = vpop.trf.xlu1 }
 0x470   :  { %v971_v2 = vpop.trf.xlu0 }
 0x471   :  { %1426 = vmatmul.mubr.msk.f32.vlgmr.msra.gmra.mrb[4].mxu0 %vm1018_vm6, %v971_v2 }
 0x473   :  { %v1004_v3 = vpop.trf.xlu1 }
 0x474   :  { %v972_v4 = vpop.trf.xlu0  ;;  %1434 = vmatprep.mubr.msk.f32.mxu1 %vm1018_vm6, %v1004_v3 }
 0x475   :  { %1428 = vmatprep.mubr.msk.f32.mxu0 %vm1018_vm6, %v972_v4 }
 0x477   :  { %v1005_v5 = vpop.trf.xlu1 }
 0x478   :  { %v973_v6 = vpop.trf.xlu0  ;;  %1435 = vmatmul.mubr.msk.f32.vlgmr.msra.gmra.mrb[10].mxu1 %vm1018_vm6, %v1005_v5 }
 0x479   :  { %1429 = vmatmul.mubr.msk.f32.gmra.mrb[6].mxu0 %vm1018_vm6, %v973_v6 }
 0x47a   :  { %1431 = vmatprep.mubr.msk.f32.mxu0 %vm1018_vm6, %v1002_v63 }
 0x47d   :  { %1432 = vmatmul.mubr.msk.f32.gmra.mrb[8].mxu0 %vm1018_vm6, %v1003_v1 }
 0x544   :  { %v1427_v62 = vpop.f32.mrb[4].mxu0 }
 0x545   :  { %v1111_v7 = vpop.f32.mrb[5].mxu0 }
 0x546   :  { %1150 = vxpose.xlu0.b32.start [1/4] (short) (narrow) %v1111_v7, 8 }
 0x54a   :  { %1151 = vxpose.xlu0.b32.cont [2/4] (short) (narrow) %v1427_v62, 8 }
 0x54b   :  { %v1436_v8 = vpop.f32.mrb[10].mxu1 }
 0x54c   :  { %v1430_v9 = vpop.f32.mrb[6].mxu0  ;;  %v1141_v10 = vpop.f32.mrb[11].mxu1 }
 0x54d   :  { %v1121_v11 = vpop.f32.mrb[7].mxu0 }
 0x54e   :  { %1152 = vxpose.xlu0.b32.cont [3/4] (short) (narrow) %v1121_v11, 8 }
 0x550   :  { %v1433_v12 = vpop.f32.mrb[8].mxu0 }
 0x551   :  { %v1131_v13 = vpop.f32.mrb[9].mxu0 }
 0x552   :  { %1153 = vxpose.xlu0.b32.end [4/4] (short) (narrow) %v1430_v9, 8  ;;  %1182 = vxpose.xlu1.b32.start [1/4] (short) (narrow) %v1131_v13, 8 }
 0x556   :  { %1183 = vxpose.xlu1.b32.cont [2/4] (short) (narrow) %v1433_v12, 8 }
 0x55a   :  { %1184 = vxpose.xlu1.b32.cont [3/4] (short) (narrow) %v1141_v10, 8 }
 0x55e   :  { %1185 = vxpose.xlu1.b32.end [4/4] (short) (narrow) %v1436_v8, 8 }
 0x5c6   :  { %v1166_v14 = vpop.trf.xlu0 }
 0x5c7   :  { %1215 = vst.msk [vmem:[#allocation7] sm:$0xf] %vm1214_vm7, %v1166_v14 }
 0x5d2   :  { %v1198_v15 = vpop.trf.xlu1 }
 0x5d3   :  { %1216 = vst.msk [vmem:[#allocation7 + $0x4] sm:$0xf] %vm1214_vm7, %v1198_v15 }
 0x5d4   :  { %1562 = shalt.err (!%p1559_p6)
}
 0x5d5   :  { %s1563_s17 = scalar_lea.hbm %s1722_s3, 128 }
 0x5d6   :  { %p1564_p7 = scmp.ne.s32.totalorder %s1722_s3, %s1563_s17  ;;  %p1567_p8 = scmp.lt.u32.totalorder %s1563_s17, %s1722_s3 }
 0x5d8   :  { %p1569_p9 = pnand %p1567_p8, %p1564_p7 }
 0x5da   :  { %1572 = shalt.err (!%p1569_p9)
}
 0x5db   :  { %s1585_s22 = smov 64   ;;  %s1586_s23 = smov 4  }
 0x5dc   :  { %1228 = dma.vmem_to_hbm [thread:$0]  %s1223_s13, 128, %s1722_s3, [#allocation4], %s1585_s22, %s1585_s22, %s1586_s23  }
 0x5dd   :  { %1577 = dma.done.wait [#allocation4], 128  }
 0x5de   :  { %1578 = vsyncadd [#allocation4], 4294967168 }
 0x5df   :  { %1232 = vsyncpa [#allocation3], 1 }
 0x5e0   :  { %1233 = vsyncpa [#allocation6], 1 }
 0x5e1   :  { %1234 = vsyncpa [#allocation4], 1 }

</bundles_post_ra>
